<compile_context>
chip_gen: v6e
topology: v6e:2x2x1
jax: 0.10.0
libtpu: 0.0.40
codegen_flags: <defaults>
</compile_context>

<pallas_src>
import math

import jax
import jax.numpy as jnp
from jax.experimental import pallas as pl
from jax.experimental.pallas import tpu as pltpu


def _code_attention_kernel(ce_ref, enc_ref, bias_ref, wt_ref,
                           wqT_ref, bq_ref, wkvT_ref, bkv_ref,
                           woxT_ref, box_ref, expand_ref,
                           out_ref, attnpk_ref):
    bb, nq, d = ce_ref.shape
    ns = enc_ref.shape[1]
    P = wt_ref.shape[-1]                 # 2 * ns_pad * nt (lane-dense slab)
    dpad = woxT_ref.shape[-1]            # d+1 padded up to a multiple of 128
    cdt = wqT_ref.dtype                  # MXU compute dtype (bf16 by default)

    # --- fused projections (pre-transposed/packed weights, batch folded into M) ---
    # nq / ns are sublane-aligned (multiples of 8) so these reshapes are free.
    ce = ce_ref[...].reshape(bb * nq, d)
    enc = enc_ref[...].reshape(bb * ns, d)

    # 1/sqrt(d) is already folded into wqT / bq by the wrapper.
    q = jnp.dot(ce, wqT_ref[...], preferred_element_type=jnp.float32) + bq_ref[...]
    kv = jnp.dot(enc, wkvT_ref[...], preferred_element_type=jnp.float32) + bkv_ref[...]

    q3 = q.reshape(bb, nq, d).astype(cdt)
    k3 = kv[:, :d].reshape(bb, ns, d).astype(cdt)
    v3 = kv[:, d:].reshape(bb, ns, d).astype(cdt)

    # --- scaled dot-product attention with additive key-padding bias ---
    s = jnp.einsum('bqd,bsd->bqs', q3, k3, preferred_element_type=jnp.float32)
    s = s + bias_ref[...]                      # (bb, 1, ns) broadcast; -1e30 on pads
    m = jnp.max(s, axis=-1, keepdims=True)
    p = jnp.exp(s - m)
    attn_w = p * pl.reciprocal(jnp.sum(p, axis=-1, keepdims=True), approx=True)
    aw = attn_w.astype(cdt)

    ctx = jnp.einsum('bqs,bsd->bqd', aw, v3, preferred_element_type=jnp.float32)

    # --- out-projection; score head and lane padding folded in -> one 128-wide store ---
    out_ext = (jnp.dot(ctx.reshape(bb * nq, d).astype(cdt), woxT_ref[...],
                       preferred_element_type=jnp.float32) + box_ref[...])
    out_ref[...] = out_ext.reshape(bb, nq, dpad).astype(out_ref.dtype)

    # --- lane-dense attention products ---
    # Expand attn_w over the token dim with a 0/1 matrix on the MXU, multiply once
    # by the packed [wla | traceback-wla] slab, store a single lane-dense result.
    aw_exp = jnp.dot(aw.reshape(bb * nq, ns), expand_ref[...],
                     preferred_element_type=jnp.float32).reshape(bb, nq, P)
    attnpk_ref[...] = (wt_ref[...] * aw_exp).astype(attnpk_ref.dtype)


def code_attention_forward(code_emb, encodings, key_padding_mask,
                           word_level_attn, traceback_word_level_attn,
                           params, block_b=None, compute_dtype=jnp.bfloat16):
    """Runs the Pallas kernel over the batch.

    Returns (scores [b, nq], attention [b, nq, ns, nt],
             traceback_attention [b, nq, ns, nt], context_vec [b, nq, d]).
    """
    b, nq, d = code_emb.shape
    _, ns, _ = encodings.shape
    nt = word_level_attn.shape[-1]
    scale = 1.0 / math.sqrt(d)

    nq_pad = ((nq + 7) // 8) * 8          # sublane-aligned query tile
    ns_pad = ((ns + 7) // 8) * 8          # sublane-aligned sentence tile
    P = 2 * ns_pad * nt                   # packed [wla | traceback-wla] lane width
    dpad = ((d + 1 + 127) // 128) * 128   # ctx + score + zero pad -> lane-dense

    # ---- one-time parameter packing (pre-transposed / fused, plain JAX) ----
    wqT = (params["wq"].T * scale).astype(compute_dtype)                  # (d, d), scale folded
    bq = (params["bq"] * scale).astype(jnp.float32)                       # (1, d)
    wkvT = jnp.concatenate([params["wk"].T, params["wv"].T], axis=1).astype(compute_dtype)
    bkv = jnp.concatenate([params["bk"], params["bv"]], axis=1).astype(jnp.float32)
    woT = params["wo"].T                                                  # (d, d)
    wlinT = params["w_lin"].T                                             # (d, 1)
    woxT = jnp.concatenate([woT, woT @ wlinT], axis=1)                    # (d, d+1)
    box = jnp.concatenate(
        [params["bo"], params["bo"] @ wlinT + params["b_lin"]], axis=1)   # (1, d+1)
    woxT = jnp.pad(woxT, ((0, 0), (0, dpad - (d + 1)))).astype(compute_dtype)
    box = jnp.pad(box, ((0, 0), (0, dpad - (d + 1)))).astype(jnp.float32)

    # 0/1 expansion matrix: sentence index -> (sentence, token) flat, twice (exact in bf16).
    expand = jnp.repeat(jnp.eye(ns_pad, dtype=jnp.float32), nt, axis=1)   # (ns_pad, ns_pad*nt)
    expand2 = jnp.concatenate([expand, expand], axis=1).astype(compute_dtype)

    # ---- batch blocking: ~256 MXU rows per step, but keep >= 2 grid steps (v7x) ----
    if block_b is None:
        block_b = max(1, (256 + nq_pad - 1) // nq_pad)
    block_b = max(1, min(block_b, b))
    if b >= 2:
        block_b = min(block_b, (b + 1) // 2)
    b_pad = ((b + block_b - 1) // block_b) * block_b
    grid = (b_pad // block_b,)

    # ---- input padding / packing ----
    ce_p = jnp.pad(code_emb,
                   ((0, b_pad - b), (0, nq_pad - nq), (0, 0))).astype(compute_dtype)
    enc_p = jnp.pad(encodings,
                    ((0, b_pad - b), (0, ns_pad - ns), (0, 0))).astype(compute_dtype)

    # Additive mask bias: -1e30 on key-padded / ns-padded sentences, 0 elsewhere.
    bias = jnp.where(key_padding_mask, jnp.float32(-1e30), jnp.float32(0.0))   # (b, ns)
    bias = jnp.pad(bias, ((0, 0), (0, ns_pad - ns)), constant_values=-1e30)
    bias = jnp.pad(bias, ((0, b_pad - b), (0, 0)))      # padded batch rows: no bias (no NaN risk)
    bias3 = bias.reshape(b_pad, 1, ns_pad)

    wla_p = jnp.pad(word_level_attn, ((0, 0), (0, ns_pad - ns), (0, 0)))
    tbw_p = jnp.pad(traceback_word_level_attn, ((0, 0), (0, ns_pad - ns), (0, 0)))
    wt_flat = jnp.concatenate([wla_p.reshape(b, ns_pad * nt),
                               tbw_p.reshape(b, ns_pad * nt)], axis=-1)
    wt_flat = jnp.pad(wt_flat, ((0, b_pad - b), (0, 0))).reshape(b_pad, 1, P)
    wt_flat = wt_flat.astype(jnp.float32)

    def bspec(*shape):
        n = len(shape)
        return pl.BlockSpec((block_b,) + shape, lambda i, _n=n: (i,) + (0,) * _n)

    def fullspec(*shape):
        n = len(shape)
        return pl.BlockSpec(shape, lambda i, _n=n: (0,) * _n)

    in_specs = [
        bspec(nq_pad, d),            # code embeddings
        bspec(ns_pad, d),            # encodings
        bspec(1, ns_pad),            # additive key-padding bias
        bspec(1, P),                 # packed [wla | traceback-wla]
        fullspec(d, d),              # WqT (scale folded)
        fullspec(1, d),              # bq
        fullspec(d, 2 * d),          # [Wk|Wv]T
        fullspec(1, 2 * d),          # [bk|bv]
        fullspec(d, dpad),           # [Wo | Wo@wlin | 0-pad]T
        fullspec(1, dpad),           # [bo | bo@wlin + b_lin | 0-pad]
        fullspec(ns_pad, P),         # expansion matrix
    ]
    out_specs = [
        bspec(nq_pad, dpad),         # merged ctx + scores (lane-dense, 128-wide)
        bspec(nq_pad, P),            # packed attention products (lane-dense)
    ]
    out_shapes = [
        jax.ShapeDtypeStruct((b_pad, nq_pad, dpad), jnp.float32),
        jax.ShapeDtypeStruct((b_pad, nq_pad, P), jnp.float32),
    ]

    # Only raise the scoped VMEM limit when the (double-buffered) blocks need it.
    isz = jnp.dtype(compute_dtype).itemsize
    blk_bytes = (block_b * nq_pad * d * isz + block_b * ns_pad * d * isz
                 + block_b * ns_pad * 4 + block_b * P * 4
                 + block_b * nq_pad * dpad * 4 + block_b * nq_pad * P * 4)
    w_bytes = (d * d + d * 2 * d + d * dpad + ns_pad * P) * isz + (d + 2 * d + dpad) * 4
    est = 2 * (blk_bytes + w_bytes)
    cp_kwargs = dict(dimension_semantics=("parallel",))
    if est > 12 * 1024 * 1024:
        cp_kwargs["vmem_limit_bytes"] = min(96 * 1024 * 1024, 3 * est)

    out_comb, attnpk = pl.pallas_call(
        _code_attention_kernel,
        grid=grid,
        in_specs=in_specs,
        out_specs=out_specs,
        out_shape=out_shapes,
        compiler_params=pltpu.CompilerParams(**cp_kwargs),
    )(ce_p, enc_p, bias3, wt_flat,
      wqT, bq, wkvT, bkv, woxT, box, expand2)

    out = out_comb[:b, :nq]                                  # (b, nq, dpad)
    ctx = out[:, :, :d]                                      # (b, nq, d)
    scores = out[:, :, d]                                    # (b, nq)
    half = ns_pad * nt
    attn = attnpk[:b, :nq, :half].reshape(b, nq, ns_pad, nt)[:, :, :ns, :]
    tb_attn = attnpk[:b, :nq, half:].reshape(b, nq, ns_pad, nt)[:, :, :ns, :]
    return scores, attn, tb_attn, ctx


# TODO(synk): `ta` (traceback attention helper) is external to the provided
# module source; implemented here as standard attention rollout (the word-level
# attention vector propagated back through per-layer, head-averaged attentions).
def traceback_word_level(self_attentions, word_level_attn):
    b, ns, nl, nh, nt, _ = self_attentions.shape
    a = self_attentions.mean(axis=3).reshape(b * ns, nl, nt, nt)
    v = word_level_attn.reshape(b * ns, 1, nt)
    for layer in range(nl - 1, -1, -1):
        v = jnp.einsum("bit,bts->bis", v, a[:, layer])
    return v.reshape(b, ns, nt)


def reference_forward(code_emb, enc, kpm, wla, tbwla, p):
    """Pure-JAX reference mirroring torch.nn.MultiheadAttention(outdim, 1)."""
    d = code_emb.shape[-1]
    scale = 1.0 / math.sqrt(d)
    q = (code_emb @ p["wq"].T + p["bq"]) * scale
    k = enc @ p["wk"].T + p["bk"]
    v = enc @ p["wv"].T + p["bv"]
    s = jnp.einsum("bqd,bsd->bqs", q, k)
    s = jnp.where(kpm[:, None, :], -jnp.inf, s)
    a = jax.nn.softmax(s, axis=-1)
    ctx = jnp.einsum("bqs,bsd->bqd", a, v)
    out = ctx @ p["wo"].T + p["bo"]
    scores = jnp.einsum("bqd,od->bqo", out, p["w_lin"]).squeeze(-1) + p["b_lin"][0, 0]
    attn = wla[:, None, :, :] * a[..., None]
    tb_attn = tbwla[:, None, :, :] * a[..., None]
    return scores, attn, tb_attn, out


if __name__ == "__main__":
    # Small shapes consistent with the forward pass.
    b, ns, nt, nq, d = 2, 8, 16, 4, 64   # batch, sentences, tokens, codes, outdim
    nl, nh = 2, 2                        # BERT-ish layers / heads for self_attentions
    vocab = 32                           # code vocabulary

    key = jax.random.PRNGKey(0)
    ks = jax.random.split(key, 12)

    # ---- deterministic parameters (shapes from Model.__init__) ----
    emb_table = 0.1 * jax.random.normal(ks[0], (vocab, d), jnp.float32)   # nn.Embedding
    in_proj_w = 0.05 * jax.random.normal(ks[1], (3 * d, d), jnp.float32)  # MHA in_proj
    in_proj_b = 0.05 * jax.random.normal(ks[2], (3 * d,), jnp.float32)
    out_proj_w = 0.05 * jax.random.normal(ks[3], (d, d), jnp.float32)     # MHA out_proj
    out_proj_b = 0.05 * jax.random.normal(ks[4], (d,), jnp.float32)
    lin_w = 0.05 * jax.random.normal(ks[5], (1, d), jnp.float32)          # nn.Linear(d, 1)
    lin_b = 0.05 * jax.random.normal(ks[6], (1,), jnp.float32)

    params = dict(
        wq=in_proj_w[:d], wk=in_proj_w[d:2 * d], wv=in_proj_w[2 * d:],
        bq=in_proj_b[:d].reshape(1, d), bk=in_proj_b[d:2 * d].reshape(1, d),
        bv=in_proj_b[2 * d:].reshape(1, d),
        wo=out_proj_w, bo=out_proj_b.reshape(1, d),
        w_lin=lin_w, b_lin=lin_b.reshape(1, 1),
    )

    # ---- synthetic inputs ----
    # TODO(synk): EncoderSentences/ClinicalBertWrapper (external BERT encoder) not
    # available; its outputs (encodings, self_attentions, word_level_attentions)
    # are replaced by deterministic synthetic tensors of the right shapes.
    codes = jax.random.randint(ks[7], (b, nq), 0, vocab)
    article_sentences_lengths = jnp.array(
        [[3, 2, 1, 4, 0, 0, 2, 1],
         [1, 0, 2, 3, 4, 1, 0, 2]], dtype=jnp.int32)                     # (b, ns)
    encodings = jax.random.normal(ks[8], (b, ns, d), jnp.float32)
    word_level_attn = jax.nn.softmax(
        jax.random.normal(ks[9], (b, ns, nt), jnp.float32), axis=-1)
    self_attentions = jax.nn.softmax(
        jax.random.normal(ks[10], (b, ns, nl, nh, nt, nt), jnp.float32), axis=-1)

    # ---- glue (plain JAX): embedding lookup, mask, traceback rollout ----
    code_emb = emb_table[codes]                                          # (b, nq, d)
    key_padding_mask = (article_sentences_lengths == 0)                  # (b, ns) bool
    tb_wla = traceback_word_level(self_attentions, word_level_attn)      # (b, ns, nt)

    # ---- pure-JAX reference ----
    r_scores, r_attn, r_tb, r_ctx = reference_forward(
        code_emb, encodings, key_padding_mask, word_level_attn, tb_wla, params)

    def close(x, y, tol):
        return bool(jnp.allclose(x, y, atol=tol, rtol=tol))

    # ---- Pallas kernel, default bf16 MXU path ----
    scores, attention, traceback_attention, context_vec = jax.block_until_ready(
        code_attention_forward(code_emb, encodings, key_padding_mask,
                               word_level_attn, tb_wla, params))

    assert scores.shape == (b, nq)
    assert attention.shape == (b, nq, ns, nt)
    assert traceback_attention.shape == (b, nq, ns, nt)
    assert context_vec.shape == (b, nq, d)
    assert close(scores, r_scores, 3e-2)
    assert close(attention, r_attn, 3e-2)
    assert close(traceback_attention, r_tb, 3e-2)
    assert close(context_vec, r_ctx, 3e-2)

    # ---- Pallas kernel, f32 MXU path (tight correctness check) ----
    s32, a32, t32, c32 = jax.block_until_ready(
        code_attention_forward(code_emb, encodings, key_padding_mask,
                               word_level_attn, tb_wla, params,
                               compute_dtype=jnp.float32))
    assert close(s32, r_scores, 5e-3)
    assert close(a32, r_attn, 5e-3)
    assert close(t32, r_tb, 5e-3)
    assert close(c32, r_ctx, 5e-3)

    print("KERNEL_OK")
</pallas_src>

<mosaic_0001>
module attributes {stable_mosaic.version = 11 : i64} {
  func.func @_code_attention_kernel(%arg0: i32, %arg1: memref<1x8x64xbf16, #tpu.memory_space<vmem>>, %arg2: memref<1x8x64xbf16, #tpu.memory_space<vmem>>, %arg3: memref<1x1x8xf32, #tpu.memory_space<vmem>>, %arg4: memref<1x1x256xf32, #tpu.memory_space<vmem>>, %arg5: memref<64x64xbf16, #tpu.memory_space<vmem>>, %arg6: memref<1x64xf32, #tpu.memory_space<vmem>>, %arg7: memref<64x128xbf16, #tpu.memory_space<vmem>>, %arg8: memref<1x128xf32, #tpu.memory_space<vmem>>, %arg9: memref<64x128xbf16, #tpu.memory_space<vmem>>, %arg10: memref<1x128xf32, #tpu.memory_space<vmem>>, %arg11: memref<8x256xbf16, #tpu.memory_space<vmem>>, %arg12: memref<1x8x128xf32, #tpu.memory_space<vmem>>, %arg13: memref<1x8x256xf32, #tpu.memory_space<vmem>>) attributes {dimension_semantics = [#tpu.dimension_semantics<parallel>], iteration_bounds = array<i64: 2>, scalar_prefetch = 0 : i64, scratch_operands = 0 : i64, tpu.core_type = #tpu.core_type<tc>, window_params = [{transform_indices = @transform_0, window_bounds = array<i64: 1, 8, 64>}, {transform_indices = @transform_1, window_bounds = array<i64: 1, 8, 64>}, {transform_indices = @transform_2, window_bounds = array<i64: 1, 1, 8>}, {transform_indices = @transform_3, window_bounds = array<i64: 1, 1, 256>}, {pipeline_mode = #tpu.pipeline_mode<synchronous>, transform_indices = @transform_4, window_bounds = array<i64: 64, 64>}, {pipeline_mode = #tpu.pipeline_mode<synchronous>, transform_indices = @transform_5, window_bounds = array<i64: 1, 64>}, {pipeline_mode = #tpu.pipeline_mode<synchronous>, transform_indices = @transform_6, window_bounds = array<i64: 64, 128>}, {pipeline_mode = #tpu.pipeline_mode<synchronous>, transform_indices = @transform_7, window_bounds = array<i64: 1, 128>}, {pipeline_mode = #tpu.pipeline_mode<synchronous>, transform_indices = @transform_8, window_bounds = array<i64: 64, 128>}, {pipeline_mode = #tpu.pipeline_mode<synchronous>, transform_indices = @transform_9, window_bounds = array<i64: 1, 128>}, {pipeline_mode = #tpu.pipeline_mode<synchronous>, transform_indices = @transform_10, window_bounds = array<i64: 8, 256>}, {transform_indices = @transform_11, window_bounds = array<i64: 1, 8, 128>}, {transform_indices = @transform_12, window_bounds = array<i64: 1, 8, 256>}]} {
    %c0 = arith.constant 0 : index
    %c0_0 = arith.constant 0 : index
    %c0_1 = arith.constant 0 : index
    %0 = vector.load %arg1[%c0, %c0_0, %c0_1] : memref<1x8x64xbf16, #tpu.memory_space<vmem>>, vector<1x8x64xbf16>
    %1 = vector.shape_cast %0 : vector<1x8x64xbf16> to vector<8x64xbf16>
    %c0_2 = arith.constant 0 : index
    %c0_3 = arith.constant 0 : index
    %c0_4 = arith.constant 0 : index
    %2 = vector.load %arg2[%c0_2, %c0_3, %c0_4] : memref<1x8x64xbf16, #tpu.memory_space<vmem>>, vector<1x8x64xbf16>
    %3 = vector.shape_cast %2 : vector<1x8x64xbf16> to vector<8x64xbf16>
    %c0_5 = arith.constant 0 : index
    %c0_6 = arith.constant 0 : index
    %4 = vector.load %arg5[%c0_5, %c0_6] : memref<64x64xbf16, #tpu.memory_space<vmem>>, vector<64x64xbf16>
    %cst = arith.constant dense<0.000000e+00> : vector<8x64xf32>
    %5 = tpu.matmul %1, %4, %cst {dimension_numbers = #tpu.dot_dimension_numbers<[1], [0], [0], [1], [0, 0, 1, 1], [], []>} : vector<8x64xbf16>, vector<64x64xbf16>, vector<8x64xf32> -> vector<8x64xf32>
    %c0_7 = arith.constant 0 : index
    %c0_8 = arith.constant 0 : index
    %6 = vector.load %arg6[%c0_7, %c0_8] : memref<1x64xf32, #tpu.memory_space<vmem>>, vector<1x64xf32>
    %7 = vector.broadcast %6 : vector<1x64xf32> to vector<8x64xf32>
    %8 = arith.addf %5, %7 : vector<8x64xf32>
    %c0_9 = arith.constant 0 : index
    %c0_10 = arith.constant 0 : index
    %9 = vector.load %arg7[%c0_9, %c0_10] : memref<64x128xbf16, #tpu.memory_space<vmem>>, vector<64x128xbf16>
    %cst_11 = arith.constant dense<0.000000e+00> : vector<8x128xf32>
    %10 = tpu.matmul %3, %9, %cst_11 {dimension_numbers = #tpu.dot_dimension_numbers<[1], [0], [0], [1], [0, 0, 1, 1], [], []>} : vector<8x64xbf16>, vector<64x128xbf16>, vector<8x128xf32> -> vector<8x128xf32>
    %c0_12 = arith.constant 0 : index
    %c0_13 = arith.constant 0 : index
    %11 = vector.load %arg8[%c0_12, %c0_13] : memref<1x128xf32, #tpu.memory_space<vmem>>, vector<1x128xf32>
    %12 = vector.broadcast %11 : vector<1x128xf32> to vector<8x128xf32>
    %13 = arith.addf %10, %12 : vector<8x128xf32>
    %14 = vector.shape_cast %8 : vector<8x64xf32> to vector<1x8x64xf32>
    %15 = arith.truncf %14 : vector<1x8x64xf32> to vector<1x8x64xbf16>
    %16 = vector.extract_strided_slice %13 {offsets = [0, 0], sizes = [8, 64], strides = [1, 1]} : vector<8x128xf32> to vector<8x64xf32>
    %17 = vector.shape_cast %16 : vector<8x64xf32> to vector<1x8x64xf32>
    %18 = arith.truncf %17 : vector<1x8x64xf32> to vector<1x8x64xbf16>
    %19 = vector.extract_strided_slice %13 {offsets = [0, 64], sizes = [8, 64], strides = [1, 1]} : vector<8x128xf32> to vector<8x64xf32>
    %20 = vector.shape_cast %19 : vector<8x64xf32> to vector<1x8x64xf32>
    %21 = arith.truncf %20 : vector<1x8x64xf32> to vector<1x8x64xbf16>
    "tpu.trace_start"() <{level = 10 : i32, message = "bqd,bsd->bqs"}> : () -> ()
    %cst_14 = arith.constant dense<0.000000e+00> : vector<1x8x8xf32>
    %22 = tpu.matmul %15, %18, %cst_14 {dimension_numbers = #tpu.dot_dimension_numbers<[2], [2], [1], [1], [0, 0, 0, 1, 1, 1], [0], [0]>} : vector<1x8x64xbf16>, vector<1x8x64xbf16>, vector<1x8x8xf32> -> vector<1x8x8xf32>
    "tpu.trace_stop"() : () -> ()
    %c0_15 = arith.constant 0 : index
    %c0_16 = arith.constant 0 : index
    %c0_17 = arith.constant 0 : index
    %23 = vector.load %arg3[%c0_15, %c0_16, %c0_17] : memref<1x1x8xf32, #tpu.memory_space<vmem>>, vector<1x1x8xf32>
    %24 = vector.broadcast %23 : vector<1x1x8xf32> to vector<1x8x8xf32>
    %25 = arith.addf %22, %24 : vector<1x8x8xf32>
    %cst_18 = arith.constant dense<0xFF800000> : vector<1x8xf32>
    %26 = vector.multi_reduction <maximumf>, %25, %cst_18 [2] : vector<1x8x8xf32> to vector<1x8xf32>
    %27 = vector.shape_cast %26 : vector<1x8xf32> to vector<1x8x1xf32>
    %28 = vector.broadcast %27 : vector<1x8x1xf32> to vector<1x8x8xf32>
    %29 = arith.subf %25, %28 : vector<1x8x8xf32>
    %30 = math.exp %29 : vector<1x8x8xf32>
    %cst_19 = arith.constant dense<0.000000e+00> : vector<1x8xf32>
    %31 = vector.multi_reduction <add>, %30, %cst_19 [2] : vector<1x8x8xf32> to vector<1x8xf32>
    %32 = vector.shape_cast %31 : vector<1x8xf32> to vector<1x8x1xf32>
    %33 = tpu.reciprocal %32 {approx = true} : vector<1x8x1xf32> -> vector<1x8x1xf32>
    %34 = vector.broadcast %33 : vector<1x8x1xf32> to vector<1x8x8xf32>
    %35 = arith.mulf %30, %34 : vector<1x8x8xf32>
    %36 = arith.truncf %35 : vector<1x8x8xf32> to vector<1x8x8xbf16>
    "tpu.trace_start"() <{level = 10 : i32, message = "bqs,bsd->bqd"}> : () -> ()
    %cst_20 = arith.constant dense<0.000000e+00> : vector<1x8x64xf32>
    %37 = tpu.matmul %36, %21, %cst_20 {dimension_numbers = #tpu.dot_dimension_numbers<[2], [1], [1], [2], [0, 0, 0, 1, 1, 2], [0], [0]>} : vector<1x8x8xbf16>, vector<1x8x64xbf16>, vector<1x8x64xf32> -> vector<1x8x64xf32>
    "tpu.trace_stop"() : () -> ()
    %38 = vector.shape_cast %37 : vector<1x8x64xf32> to vector<8x64xf32>
    %39 = arith.truncf %38 : vector<8x64xf32> to vector<8x64xbf16>
    %c0_21 = arith.constant 0 : index
    %c0_22 = arith.constant 0 : index
    %40 = vector.load %arg9[%c0_21, %c0_22] : memref<64x128xbf16, #tpu.memory_space<vmem>>, vector<64x128xbf16>
    %cst_23 = arith.constant dense<0.000000e+00> : vector<8x128xf32>
    %41 = tpu.matmul %39, %40, %cst_23 {dimension_numbers = #tpu.dot_dimension_numbers<[1], [0], [0], [1], [0, 0, 1, 1], [], []>} : vector<8x64xbf16>, vector<64x128xbf16>, vector<8x128xf32> -> vector<8x128xf32>
    %c0_24 = arith.constant 0 : index
    %c0_25 = arith.constant 0 : index
    %42 = vector.load %arg10[%c0_24, %c0_25] : memref<1x128xf32, #tpu.memory_space<vmem>>, vector<1x128xf32>
    %43 = vector.broadcast %42 : vector<1x128xf32> to vector<8x128xf32>
    %44 = arith.addf %41, %43 : vector<8x128xf32>
    %45 = vector.shape_cast %44 : vector<8x128xf32> to vector<1x8x128xf32>
    %c0_26 = arith.constant 0 : index
    %c0_27 = arith.constant 0 : index
    %c0_28 = arith.constant 0 : index
    %46 = vector.load %arg12[%c0_26, %c0_27, %c0_28] : memref<1x8x128xf32, #tpu.memory_space<vmem>>, vector<1x8x128xf32>
    tpu.vector_store %arg12[%c0_26, %c0_27, %c0_28], %45 {strides = array<i32>} : memref<1x8x128xf32, #tpu.memory_space<vmem>>, vector<1x8x128xf32>,
    %47 = vector.shape_cast %36 : vector<1x8x8xbf16> to vector<8x8xbf16>
    %c0_29 = arith.constant 0 : index
    %c0_30 = arith.constant 0 : index
    %48 = vector.load %arg11[%c0_29, %c0_30] : memref<8x256xbf16, #tpu.memory_space<vmem>>, vector<8x256xbf16>
    %cst_31 = arith.constant dense<0.000000e+00> : vector<8x256xf32>
    %49 = tpu.matmul %47, %48, %cst_31 {dimension_numbers = #tpu.dot_dimension_numbers<[1], [0], [0], [1], [0, 0, 1, 1], [], []>} : vector<8x8xbf16>, vector<8x256xbf16>, vector<8x256xf32> -> vector<8x256xf32>
    %50 = vector.shape_cast %49 : vector<8x256xf32> to vector<1x8x256xf32>
    %c0_32 = arith.constant 0 : index
    %c0_33 = arith.constant 0 : index
    %c0_34 = arith.constant 0 : index
    %51 = vector.load %arg4[%c0_32, %c0_33, %c0_34] : memref<1x1x256xf32, #tpu.memory_space<vmem>>, vector<1x1x256xf32>
    %52 = vector.broadcast %51 : vector<1x1x256xf32> to vector<1x8x256xf32>
    %53 = arith.mulf %52, %50 : vector<1x8x256xf32>
    %c0_35 = arith.constant 0 : index
    %c0_36 = arith.constant 0 : index
    %c0_37 = arith.constant 0 : index
    %54 = vector.load %arg13[%c0_35, %c0_36, %c0_37] : memref<1x8x256xf32, #tpu.memory_space<vmem>>, vector<1x8x256xf32>
    tpu.vector_store %arg13[%c0_35, %c0_36, %c0_37], %53 {strides = array<i32>} : memref<1x8x256xf32, #tpu.memory_space<vmem>>, vector<1x8x256xf32>,
    return
  }
  func.func @transform_0(%arg0: i32) -> (i32, i32, i32) {
    %c0_i32 = arith.constant 0 : i32
    %c0_i32_0 = arith.constant 0 : i32
    %c0_i32_1 = arith.constant 0 : i32
    return %arg0, %c0_i32, %c0_i32_0 : i32, i32, i32
  }
  func.func @transform_1(%arg0: i32) -> (i32, i32, i32) {
    %c0_i32 = arith.constant 0 : i32
    %c0_i32_0 = arith.constant 0 : i32
    %c0_i32_1 = arith.constant 0 : i32
    return %arg0, %c0_i32, %c0_i32_0 : i32, i32, i32
  }
  func.func @transform_2(%arg0: i32) -> (i32, i32, i32) {
    %c0_i32 = arith.constant 0 : i32
    %c0_i32_0 = arith.constant 0 : i32
    %c0_i32_1 = arith.constant 0 : i32
    return %arg0, %c0_i32, %c0_i32_0 : i32, i32, i32
  }
  func.func @transform_3(%arg0: i32) -> (i32, i32, i32) {
    %c0_i32 = arith.constant 0 : i32
    %c0_i32_0 = arith.constant 0 : i32
    %c0_i32_1 = arith.constant 0 : i32
    return %arg0, %c0_i32, %c0_i32_0 : i32, i32, i32
  }
  func.func @transform_4(%arg0: i32) -> (i32, i32) {
    %c0_i32 = arith.constant 0 : i32
    %c0_i32_0 = arith.constant 0 : i32
    %c0_i32_1 = arith.constant 0 : i32
    return %c0_i32, %c0_i32_0 : i32, i32
  }
  func.func @transform_5(%arg0: i32) -> (i32, i32) {
    %c0_i32 = arith.constant 0 : i32
    %c0_i32_0 = arith.constant 0 : i32
    %c0_i32_1 = arith.constant 0 : i32
    return %c0_i32, %c0_i32_0 : i32, i32
  }
  func.func @transform_6(%arg0: i32) -> (i32, i32) {
    %c0_i32 = arith.constant 0 : i32
    %c0_i32_0 = arith.constant 0 : i32
    %c0_i32_1 = arith.constant 0 : i32
    return %c0_i32, %c0_i32_0 : i32, i32
  }
  func.func @transform_7(%arg0: i32) -> (i32, i32) {
    %c0_i32 = arith.constant 0 : i32
    %c0_i32_0 = arith.constant 0 : i32
    %c0_i32_1 = arith.constant 0 : i32
    return %c0_i32, %c0_i32_0 : i32, i32
  }
  func.func @transform_8(%arg0: i32) -> (i32, i32) {
    %c0_i32 = arith.constant 0 : i32
    %c0_i32_0 = arith.constant 0 : i32
    %c0_i32_1 = arith.constant 0 : i32
    return %c0_i32, %c0_i32_0 : i32, i32
  }
  func.func @transform_9(%arg0: i32) -> (i32, i32) {
    %c0_i32 = arith.constant 0 : i32
    %c0_i32_0 = arith.constant 0 : i32
    %c0_i32_1 = arith.constant 0 : i32
    return %c0_i32, %c0_i32_0 : i32, i32
  }
  func.func @transform_10(%arg0: i32) -> (i32, i32) {
    %c0_i32 = arith.constant 0 : i32
    %c0_i32_0 = arith.constant 0 : i32
    %c0_i32_1 = arith.constant 0 : i32
    return %c0_i32, %c0_i32_0 : i32, i32
  }
  func.func @transform_11(%arg0: i32) -> (i32, i32, i32) {
    %c0_i32 = arith.constant 0 : i32
    %c0_i32_0 = arith.constant 0 : i32
    %c0_i32_1 = arith.constant 0 : i32
    return %arg0, %c0_i32, %c0_i32_0 : i32, i32, i32
  }
  func.func @transform_12(%arg0: i32) -> (i32, i32, i32) {
    %c0_i32 = arith.constant 0 : i32
    %c0_i32_0 = arith.constant 0 : i32
    %c0_i32_1 = arith.constant 0 : i32
    return %arg0, %c0_i32, %c0_i32_0 : i32, i32, i32
  }
}

</mosaic_0001>

<bundles_post_ra>
// kernel: tpu_custom_call.1
= control target key start
LH: loop header
LB: loop body
LE: loop exit
PB: predicated region body
PF: predicated region fallthrough
CT: control target
= control target key end

     0   :  { %s2156_s0 = inlined_call_operand.hbm [shape: bf16[2,8,64], index: 0, kind: input, shape index: {}]   ;;  %s2157_s1 = inlined_call_operand.hbm [shape: bf16[2,8,64], index: 1, kind: input, shape index: {}]   ;;  %s2158_s2 = inlined_call_operand.hbm [shape: f32[2,1,8], index: 2, kind: input, shape index: {}]   ;;  %s2159_s3 = inlined_call_operand.vmem [shape: f32[2,1,256], index: 3, kind: input, shape index: {}]   ;;  %s2160_s4 = inlined_call_operand.hbm [shape: bf16[64,64], index: 4, kind: input, shape index: {}]   ;;  %s2161_s5 = inlined_call_operand.vmem [shape: f32[1,64], index: 5, kind: input, shape index: {}]   ;;  %s2162_s6 = inlined_call_operand.hbm [shape: bf16[64,128], index: 6, kind: input, shape index: {}]   ;;  %s2163_s7 = inlined_call_operand.vmem [shape: f32[1,128], index: 7, kind: input, shape index: {}]   ;;  %s2164_s8 = inlined_call_operand.hbm [shape: bf16[64,128], index: 8, kind: input, shape index: {}]   ;;  %s2165_s9 = inlined_call_operand.vmem [shape: f32[1,128], index: 9, kind: input, shape index: {}]   ;;  %s2166_s10 = inlined_call_operand.vmem [shape: bf16[8,256], index: 10, kind: input, shape index: {}]   ;;  %s2167_s11 = inlined_call_operand.hbm [shape: f32[2,8,128], index: 11, kind: output, shape index: {0}]   ;;  %s2168_s12 = inlined_call_operand.hbm [shape: f32[2,8,256], index: 12, kind: output, shape index: {1}]  }
   0x1   :  { %2191 = sst [smem:[#allocation28_spill]] %s2156_s0 }
   0x2   :  { %2192 = sst [smem:[#allocation29_spill]] %s2157_s1 }
   0x3   :  { %2193 = sst [smem:[#allocation30_spill]] %s2160_s4 }
   0x4   :  { %2194 = sst [smem:[#allocation31_spill]] %s2165_s9 }
   0x5   :  { %2195 = sst [smem:[#allocation32_spill]] %s2167_s11 }
   0x6   :  { %2196 = sst [smem:[#allocation33_spill]] %s2168_s12 }
   0x7   :  { %18 = vsyncpa [#allocation3], 0 }
   0x8   :  { %20 = vsyncpa [#allocation3 + $0x1], 0 }
   0x9   :  { %21 = vsyncpa [#allocation6], 0 }
   0xa   :  { %23 = vsyncpa [#allocation6 + $0x1], 0 }
   0xb   :  { %24 = vsyncpa [#allocation9], 0 }
   0xc   :  { %25 = vsyncpa [#allocation12], 0 }
   0xd   :  { %26 = vsyncpa [#allocation4], 0 }
   0xe   :  { %28 = vsyncpa [#allocation4 + $0x1], 0 }
   0xf   :  { %29 = vsyncpa [#allocation15], 0 }
  0x10   :  { %31 = vsyncpa [#allocation15 + $0x1], 0  ;;  %s1809_s21 = smov 0   ;;  %s1811_s22 = smov 0  }
  0x11   :  { %s1813_s23 = smov 0   ;;  %s1815_s24 = smov 0  }
  0x12 LB: > { %2197 = sst [smem:[#allocation22_spill]] %s1716_s21  ;;  %s1830_s25 = sadd.s32 4294967295, %s1728_s24   ;;  %s1728_s24 = sphi %s1815_s24, %s2235_s24   ;;  %s1724_s23 = sphi %s1813_s23, %s2240_s23   ;;  %s1720_s22 = sphi %s1811_s22, %s2239_s22   ;;  %s1716_s21 = sphi %s1809_s21, %s2238_s21  }
  0x13   : > { %2198 = sst [smem:[#allocation23_spill]] %s1724_s23  ;;  %s1224_s26 = sadd.s32 4294967294, %s1728_s24  }
  0x14   : > { %p57_p0 = scmp.ne.s32.totalorder %s1720_s22, %s1716_s21  ;;  %p2181_p1 = scmp.eq.s32.totalorder %s1830_s25, 0 }
  0x15   : > { %p306_p2 = scmp.eq.s32.totalorder %s1830_s25, 1  ;;  %p312_p3 = scmp.eq.s32.totalorder %s1224_s26, 1 }
  0x16   : > { %p1839_p4 = por %p2181_p1, %p57_p0  ;;  %p1225_p5 = scmp.ge.s32.totalorder %s1728_s24, 1 }
  0x17   : > { %p1844_p6 = por %p312_p3, %p57_p0  ;;  %p345_p7 = scmp.lt.s32.totalorder %s1728_s24, 3 }
  0x18   : > { %s2199_s27 = scalar_select %p1839_p4, 1, 0 }
  0x19   : > { %s2200_s28 = scalar_select %p1844_p6, 1, 0 }
  0x1a   : > { %p1849_p8 = pnand %p1225_p5, %p345_p7  ;;  %s1730_s30 = smov [#allocation8]  }
  0x1b   : > { %2201 = sst [smem:[#allocation24_spill]] %s2200_s28  ;;  %s357_s13 = sshll.u32 %s1730_s30, 4  ;;  %s358_s13 = int_to_ptr.vmem [resolvable:$true] %s357_s13 }
  0x1c   : > { %s2202_s29 = scalar_select %p1849_p8, 1, 0 }
  0x1d   : > { %p1366_p9 = pneg %p1849_p8  ;;  %s1863_s15 = sadd.s32 1, %s1728_s24  }
  0x1e   : > { %2204 = sst [smem:[#allocation25_spill]] %s1863_s15  ;;  %s44_s16 = sadd.s32 1, %s1724_s23 }
  0x1f   : > { %p1858_p11 = pnand %p1366_p9, %p2181_p1  ;;  %s41_s17 = ssub.s32 %s1728_s24, %s1863_s15 }
  0x20   : > { %s1471_s18 = scalar_lea.vmem %s358_s13, 512  ;;  %p1479_p5 = scmp.lt.s32.totalorder %s358_s13, %s358_s13 }
  0x21   : > { %s2203_s14 = scalar_select %p1858_p11, 1, 0 }
  0x22   : > { %p2182_p12 = pneg %p1858_p11  ;;  %p1472_p13 = scmp.ne.s32.totalorder %s358_s13, %s1471_s18 }
  0x23   : > { %p1480_p7 = scmp.lt.s32.totalorder %s1471_s18, %s1471_s18 }
  0x24   : > { %p1474_p0 = pnand %p1472_p13, %p2182_p12 }
  0x25   : > { %p1481_p9 = por %p1480_p7, %p1479_p5 }
  0x26   : > { %p1475_p3 = pneg %p1474_p0 }
  0x28   : > { %p1482_p10 = pnand %p1481_p9, %p1475_p3 }
  0x2a   : > { %1485 = shalt.err (!%p1482_p10)
}
  0x2b   : > { %s2174_s19 = smov 64   ;;  %s2176_s20 = smov 4  }
  0x2c   : > { %s2205_s4 = sld [smem:[#allocation30_spill]]  ;;  %p42_p10 = scmp.eq.s32.totalorder %s41_s17, 0 }
  0x2d   : > { %p51_p13 = scmp.ne.s32.totalorder %s1724_s23, %s1720_s22  ;;  %p52_p0 = scmp.eq.s32.totalorder %s1728_s24, 0 }
  0x2e   : > { %p1396_p3 = scmp.lt.s32.totalorder %s1728_s24, 2  ;;  %s1895_s28 = sand.u32 1, %s1724_s23  }
  0x2f   : > { %s1886_s18 = scalar_select %p42_p10, %s1724_s23, %s44_s16  }
  0x30   : > { %p53_p5 = por %p52_p0, %p51_p13  ;;  %p1890_p7 = por %p306_p2, %p51_p13 }
  0x31   : > { %2206 = sst [smem:[#allocation26_spill]] %s1886_s18  ;;  %s2179_s21 = sshll.u32 %s1728_s24, 6 }
  0x32   : > { %1369 = dma.hbm_to_vmem [thread:$0]  (!%p1858_p11), %s2205_s4, 512, %s358_s13, [#allocation9], %s2174_s19, %s2174_s19, %s2176_s20  }
  0x33   : > { %s2207_s15 = scalar_select %p1890_p7, 1, 0 }
  0x34   : > { %s2180_s11 = sshll.u32 %s1895_s28, 2  ;;  %p1899_p9 = pnand %p1396_p3, %p53_p5 }
  0x35   : > { %2208 = sst [smem:[#allocation27_spill]] %s2207_s15  ;;  %s427_s17 = sand.u32 1, %s1728_s24  }
  0x36   : > { %s2210_s1 = sld [smem:[#allocation29_spill]]  ;;  %s431_s19 = scalar_lea.vmem [#allocation5], %s2180_s11 }
  0x37   : > { %s438_s20 = sshll.u32 %s431_s19, 4  ;;  %s1913_s4 = scalar_lea.sflag [#allocation6], %s427_s17  ;;  %s439_s20 = int_to_ptr.vmem [resolvable:$true] %s438_s20 }
  0x38   : > { %p1919_p10 = pneg %p1899_p9 }
  0x3c   : > { %s1909_s30 = scalar_lea.hbm %s2210_s1, %s2179_s21  ;;  %s1491_s21 = scalar_lea.hbm %s2210_s1, 128 }
  0x3d   : > { %s1486_s18 = scalar_lea.hbm %s1909_s30, 64  ;;  %p1492_p3 = scmp.lt.s32.totalorder %s1909_s30, %s2210_s1 }
  0x3e   : > { %p1487_p2 = scmp.ne.s32.totalorder %s1909_s30, %s1486_s18  ;;  %p1493_p5 = scmp.lt.s32.totalorder %s1491_s21, %s1486_s18 }
  0x40   : > { %p1489_p13 = pnand %p1919_p10, %p1487_p2  ;;  %p1494_p1 = por %p1493_p5, %p1492_p3 }
  0x42   : > { %p1490_p0 = pneg %p1489_p13 }
  0x44   : > { %p1495_p12 = pnand %p1494_p1, %p1490_p0 }
  0x46   : > { %1498 = shalt.err (!%p1495_p12)
}
  0x47   : > { %s1499_s17 = scalar_lea.vmem %s439_s20, 64  ;;  %s1733_s9 = smov [#allocation5]  }
  0x48   : > { %p1500_p6 = scmp.ne.s32.totalorder %s439_s20, %s1499_s17  ;;  %s1504_s12 = sshll.u32 %s1733_s9, 4  ;;  %s1505_s12 = int_to_ptr.vmem [resolvable:$false] %s1504_s12 }
  0x49   : > { %s1506_s15 = scalar_lea.vmem %s1505_s12, 128  ;;  %p1507_p2 = scmp.lt.s32.totalorder %s439_s20, %s1505_s12 }
  0x4a   : > { %p1502_p7 = pnand %p1500_p6, %p1919_p10  ;;  %p1508_p13 = scmp.lt.s32.totalorder %s1506_s15, %s1499_s17 }
  0x4c   : > { %p1503_p4 = pneg %p1502_p7  ;;  %p1509_p8 = por %p1508_p13, %p1507_p2 }
  0x4e   : > { %p1510_p11 = pnand %p1509_p8, %p1503_p4 }
  0x50   : > { %1513 = shalt.err (!%p1510_p11)
}
  0x51   : > { %1382 = dma.hbm_to_vmem [thread:$0]  (!%p1899_p9), %s1909_s30, 64, %s439_s20, %s1913_s4  }
  0x52   : > { %s1734_s11 = smov [#allocation10]   ;;  %s1735_s18 = smov [#allocation11]  }
  0x53   : > { %s373_s21 = sshll.u32 %s1734_s11, 4  ;;  %s389_s16 = sshll.u32 %s1735_s18, 4  ;;  %s374_s21 = int_to_ptr.vmem [resolvable:$true] %s373_s21  ;;  %s390_s16 = int_to_ptr.vmem [resolvable:$true] %s389_s16 }
  0x54   : > { %s1525_s26 = scalar_lea.vmem %s374_s21, 512  ;;  %p2212_p6 = scmp.ne.s32.totalorder %s2203_s14, 0 }
  0x55   : > { %p1526_p1 = scmp.ne.s32.totalorder %s374_s21, %s1525_s26  ;;  %p1533_p3 = scmp.lt.s32.totalorder %s374_s21, %s374_s21 }
  0x56   : > { %p2213_p12 = pneg %p2212_p6  ;;  %p1534_p4 = scmp.lt.s32.totalorder %s1525_s26, %s1525_s26 }
  0x58   : > { %p1528_p7 = pnand %p1526_p1, %p2213_p12  ;;  %p1535_p8 = por %p1534_p4, %p1533_p3 }
  0x5a   : > { %p1529_p0 = pneg %p1528_p7 }
  0x5c   : > { %p1536_p11 = pnand %p1535_p8, %p1529_p0 }
  0x5e   : > { %1539 = shalt.err (!%p1536_p11)
}
  0x5f   : > { %s2214_s9 = smov 4   ;;  %s2215_s12 = smov 64  }
  0x60   : > { %1372 = dma.hbm_to_vmem [thread:$0]  (!%p2212_p6), %s2162_s6, 512, %s374_s21, [#allocation9], %s2215_s12, %s2215_s12, %s2214_s9  }
  0x61   : > { %s1551_s30 = scalar_lea.vmem %s390_s16, 512  ;;  %p2216_p2 = pmov %p2213_p12 }
  0x62   : > { %p1552_p5 = scmp.ne.s32.totalorder %s390_s16, %s1551_s30  ;;  %p1559_p12 = scmp.lt.s32.totalorder %s390_s16, %s390_s16 }
  0x63   : > { %p1560_p7 = scmp.lt.s32.totalorder %s1551_s30, %s1551_s30 }
  0x64   : > { %p1554_p13 = pnand %p1552_p5, %p2216_p2 }
  0x65   : > { %p1561_p0 = por %p1560_p7, %p1559_p12 }
  0x66   : > { %p1555_p1 = pneg %p1554_p13 }
  0x68   : > { %p1562_p3 = pnand %p1561_p0, %p1555_p1 }
  0x6a   : > { %1565 = shalt.err (!%p1562_p3)
}
  0x6b   : > { %1375 = dma.hbm_to_vmem [thread:$0]  (!%p2212_p6), %s2164_s8, 512, %s390_s16, [#allocation12], %s2215_s12, %s2215_s12, %s2214_s9  }
  0x6c   : > { %s2217_s11 = sshll.u32 %s1728_s24, 6  ;;  %s2218_s0 = sld [smem:[#allocation28_spill]] }
  0x6d   : > { %s2219_s15 = sshll.u32 %s1895_s28, 2  ;;  %s1234_s30 = sshll.u32 %s1728_s24, 4 }
  0x6e   : > { %s413_s14 = scalar_lea.vmem [#allocation2], %s2219_s15  ;;  %s410_s19 = scalar_lea.sflag [#allocation3], %s1895_s28 }
  0x6f   : > { %s420_s20 = sshll.u32 %s413_s14, 4  ;;  %s421_s20 = int_to_ptr.vmem [resolvable:$true] %s420_s20 }
  0x72   : > { %s1965_s26 = scalar_lea.hbm %s2218_s0, %s2217_s11  ;;  %s1571_s12 = scalar_lea.hbm %s2218_s0, 128 }
  0x73   : > { %s1566_s17 = scalar_lea.hbm %s1965_s26, 64  ;;  %p1572_p11 = scmp.lt.s32.totalorder %s1965_s26, %s2218_s0 }
  0x74   : > { %p1567_p4 = scmp.ne.s32.totalorder %s1965_s26, %s1566_s17  ;;  %p1573_p5 = scmp.lt.s32.totalorder %s1571_s12, %s1566_s17 }
  0x76   : > { %p1569_p8 = pnand %p1567_p4, %p1919_p10  ;;  %p1574_p2 = por %p1573_p5, %p1572_p11 }
  0x78   : > { %p1570_p6 = pneg %p1569_p8 }
  0x7a   : > { %p1575_p13 = pnand %p1574_p2, %p1570_p6 }
  0x7c   : > { %1578 = shalt.err (!%p1575_p13)
}
  0x7d   : > { %s1579_s18 = scalar_lea.vmem %s421_s20, 64  ;;  %s1736_s15 = smov [#allocation2]  }
  0x7e   : > { %p1580_p1 = scmp.ne.s32.totalorder %s421_s20, %s1579_s18  ;;  %s1584_s14 = sshll.u32 %s1736_s15, 4  ;;  %s1585_s14 = int_to_ptr.vmem [resolvable:$false] %s1584_s14 }
  0x7f   : > { %s1586_s1 = scalar_lea.vmem %s1585_s14, 128  ;;  %p1587_p0 = scmp.lt.s32.totalorder %s421_s20, %s1585_s14 }
  0x80   : > { %p1582_p12 = pnand %p1580_p1, %p1919_p10  ;;  %p1588_p3 = scmp.lt.s32.totalorder %s1586_s1, %s1579_s18 }
  0x82   : > { %p1583_p7 = pneg %p1582_p12  ;;  %p1589_p4 = por %p1588_p3, %p1587_p0 }
  0x84   : > { %p1590_p8 = pnand %p1589_p4, %p1583_p7 }
  0x86   : > { %1593 = shalt.err (!%p1590_p8)
}
  0x87   : > { %1379 = dma.hbm_to_vmem [thread:$0]  (!%p1899_p9), %s1965_s26, 64, %s421_s20, %s410_s19  }
  0x88   : > { %s453_s9 = scalar_lea.hbm %s2158_s2, %s1234_s30  ;;  %s448_s12 = scalar_lea.vmem [#allocation7], %s1895_s28 }
  0x89   : > { %s455_s11 = sshll.u32 %s448_s12, 4  ;;  %s1594_s21 = scalar_lea.hbm %s453_s9, 16  ;;  %s456_s11 = int_to_ptr.vmem [resolvable:$true] %s455_s11 }
  0x8a   : > { %p1595_p6 = scmp.ne.s32.totalorder %s453_s9, %s1594_s21  ;;  %s1599_s15 = scalar_lea.hbm %s2158_s2, 32 }
  0x8b   : > { %p1600_p2 = scmp.lt.s32.totalorder %s453_s9, %s2158_s2  ;;  %p1601_p13 = scmp.lt.s32.totalorder %s1599_s15, %s1594_s21 }
  0x8c   : > { %p1597_p11 = pnand %p1595_p6, %p1919_p10 }
  0x8d   : > { %p1602_p1 = por %p1601_p13, %p1600_p2 }
  0x8e   : > { %p1598_p5 = pneg %p1597_p11 }
  0x90   : > { %p1603_p12 = pnand %p1602_p1, %p1598_p5 }
  0x92   : > { %1606 = shalt.err (!%p1603_p12)
}
  0x93   : > { %s1607_s28 = scalar_lea.vmem %s456_s11, 16  ;;  %s1737_s26 = smov [#allocation7]  }
  0x94   : > { %p1608_p7 = scmp.ne.s32.totalorder %s456_s11, %s1607_s28  ;;  %s1612_s20 = sshll.u32 %s1737_s26, 4  ;;  %s1613_s20 = int_to_ptr.vmem [resolvable:$false] %s1612_s20 }
  0x95   : > { %s1614_s30 = scalar_lea.vmem %s1613_s20, 32  ;;  %p1615_p4 = scmp.lt.s32.totalorder %s456_s11, %s1613_s20 }
  0x96   : > { %p1610_p0 = pnand %p1608_p7, %p1919_p10  ;;  %p1616_p8 = scmp.lt.s32.totalorder %s1614_s30, %s1607_s28 }
  0x98   : > { %p1611_p3 = pneg %p1610_p0  ;;  %p1617_p6 = por %p1616_p8, %p1615_p4 }
  0x9a   : > { %p1618_p11 = pnand %p1617_p6, %p1611_p3 }
  0x9c   : > { %1621 = shalt.err (!%p1618_p11)
}
  0x9d   : > { %1385 = dma.hbm_to_vmem [thread:$0]  (!%p1899_p9), %s453_s9, 16, %s456_s11, %s1913_s4  }
  0x9e   : > { %p2220_p5 = scmp.ne.s32.totalorder %s2202_s29, 0 }
  0x9f   : > { %s2007_s0 = sand.u32 (!%p2220_p5), 1, %s1720_s22   ;;  %p2221_p10 = scmp.ne.s32.totalorder (!%p2220_p5), %s2199_s27, 0 }
  0xa0   : > { %471 = sbr.rel (%p2220_p5) target bundleno = 1312 (0x520), region = 64  ;;  %s1236_s23 = sshll.u32 (!%p2220_p5), %s2007_s0, 2 }
  0xa1   : > { %s474_s19 = scalar_lea.sflag (!%p2220_p5), [#allocation3], %s2007_s0  ;;  %s2011_s17 = scalar_lea.vmem (!%p2220_p5), [#allocation2], %s1236_s23 }
  0xa5   : > { %1691 = dma.done.wait (%p2221_p10), %s474_s19, 64  }
  0xa6   : > { %1693 = vsyncadd (%p2221_p10), %s474_s19, 4294967232  ;;  %s482_s4 = sand.u32 1, %s1830_s25   ;;  %s2018_s13 = scalar_lea.vmem [#allocation5], %s1236_s23 }
  0xa7   : > { %s483_s29 = scalar_lea.sflag [#allocation6], %s482_s4 }
  0xa8   : > { %1695 = dma.done.wait (%p2221_p10), %s483_s29, 80  }
  0xa9   : > { %1697 = vsyncadd (%p2221_p10), %s483_s29, 4294967216  ;;  %s494_s16 = scalar_lea.vmem [#allocation7], %s2007_s0  ;;  %p2222_p9 = scmp.eq.s32.totalorder %s1830_s25, 0 }
  0xab   : > { %1699 = dma.done.wait (%p2222_p9), [#allocation9], 1024   ;;  %p2223_p2 = pmov %p2222_p9 }
  0xad   : > { %1701 = vsyncadd (%p2223_p2), [#allocation9], 4294966272  ;;  %p2224_p13 = pmov %p2223_p2 }
  0xae   : > { %p2225_p1 = pmov %p2223_p2 }
  0xaf   : > { %1703 = dma.done.wait (%p2224_p13), [#allocation12], 512  }
  0xb0   : > { %1705 = vsyncadd (%p2225_p1), [#allocation12], 4294966784  ;;  %v1738_v0 = vmov 0.0   ;;  %vm1739_vm0 = vmmov 0   ;;  %v1442_v1 = vld [vmem:[#allocation10 + $0x18] sm:$0xff]   ;;  %v1444_v3 = vld [vmem:[#allocation10 + $0x10] sm:$0xff]   ;;  %v994_v53 = vlaneseq }
  0xb1   : > { %1308 = vmatprep.subr.bf16.mxu1 %v1738_v0  ;;  %1296 = vmatprep.subr.bf16.mxu0 %v1738_v0  ;;  %v1443_v2 = vld [vmem:[#allocation8 + $0x18] sm:$0xff]   ;;  %v1445_v4 = vld [vmem:[#allocation8 + $0x10] sm:$0xff]   ;;  %v1446_v5 = vld [vmem:[#allocation10 + $0x8] sm:$0xff]   ;;  %vm611_vm1 = vcmask 523264   ;;  %s1740_s21 = smov 64   ;;  %vm811_vm2 = vcmask 1043456  }
  0xb2   : > { %1316 = vmatprep.mubr.msk.bf16.mxu1 %vm1739_vm0, %v1738_v0  ;;  %1304 = vmatprep.mubr.msk.bf16.mxu0 %vm1739_vm0, %v1738_v0  ;;  %v1447_v6 = vld [vmem:[#allocation8 + $0x8] sm:$0xff]   ;;  %v1448_v7 = vld [vmem:[#allocation10] sm:$0xff]   ;;  %v571_v9 = vld [vmem:[%s2018_s13] sm:$0xf]  ;;  %vm792_vm3 = vcmask 64512   ;;  %v1741_v51 = vmov 0  }
  0xb3   : > { %1309 = vmatpush3.bf16.msra.mxu1 %v1442_v1  ;;  %1297 = vmatpush3.bf16.msra.mxu0 %v1443_v2  ;;  %v1449_v8 = vld [vmem:[#allocation8] sm:$0xff]   ;;  %v570_v10 = vld [vmem:[%s2011_s17] sm:$0xf]  ;;  %v1452_v42 = vld [vmem:[#allocation11 + $0x18] sm:$0xff]   ;;  %p565_p12 = scmp.lt.s32.totalorder %s1830_s25, 1  ;;  %v995_v54 = vshrl.u32 %v994_v53, 7 }
  0xb4   : > { %1310 = vmatprep.subr.bf16.mxu1 %v1738_v0  ;;  %1298 = vmatprep.subr.bf16.mxu0 %v1738_v0  ;;  %v1250_v11 = vld [vmem:[%s2163_s7] ss:$0 sm:$0xff]  ;;  %v1453_v43 = vld [vmem:[#allocation11 + $0x10] sm:$0xff]   ;;  %v1455_v52 = vld [vmem:[#allocation11] sm:$0xff]   ;;  %s1242_s30 = sshll.u32 %s2007_s0, 4  ;;  %s2226_s23 = sld [smem:[#allocation27_spill]] }
  0xb5   : > { %v1244_v16 = vld [vmem:[%s2161_s5] ss:$0 sm:$0xff]  ;;  %s566_s15 = scalar_select %p565_p12, %s1830_s25, 1  ;;  %v996_v57 = vsub.s32 0, %v995_v54  ;;  %v1000_v60 = vsub.s32 1, %v995_v54 }
  0xb6   : > { %v1256_v28 = vld [vmem:[%s494_s16] ss:$0 sm:$0xff]  ;;  %s564_s19 = scalar_lea.vmem [#allocation14], %s1242_s30  ;;  %s1276_s17 = sshll.u32 %s1830_s25, 8 }
  0xb7   : > { %1311 = vmatpush3.bf16.msra.mxu1 %v1444_v3  ;;  %1299 = vmatpush3.bf16.msra.mxu0 %v1445_v4  ;;  %v939_v40 = vld [vmem:[%s2166_s10] sm:$0xff]  ;;  %s1243_s14 = sshll.u32 %s566_s15, 1  ;;  %s1041_s4 = sshll.u32 %s564_s19, 4  ;;  %s1042_s4 = int_to_ptr.vmem [resolvable:$true] %s1041_s4 }
  0xb8   : > { %1312 = vmatprep.subr.bf16.mxu1 %v1738_v0  ;;  %1300 = vmatprep.subr.bf16.mxu0 %v1738_v0  ;;  %v1266_v41 = vcombine.high %v939_v40, %v939_v40  ;;  %v1454_v44 = vld [vmem:[#allocation11 + $0x8] sm:$0xff]   ;;  %v1265_v46 = vcombine.low %v939_v40, %v939_v40  ;;  %s568_s20 = scalar_lea.vmem %s2159_s3, %s1243_s14  ;;  %s2227_s16 = sld [smem:[#allocation33_spill]] }
  0xb9   : > { %v992_v59 = vld [vmem:[%s568_s20] sm:$0x3]  ;;  %s1014_s9 = scalar_lea.sflag [#allocation15], %s2007_s0  ;;  %s1622_s12 = scalar_lea.vmem %s1042_s4, 256 }
  0xba   : > { %v946_v50 = vsel %vm811_vm2, %v1265_v46, 0  ;;  %v997_v62 = vrot.slane %v992_v59, %v996_v57  ;;  %p1623_p7 = scmp.ne.s32.totalorder %s1042_s4, %s1622_s12  ;;  %p2228_p0 = scmp.ne.s32.totalorder %s2226_s23, 0 }
  0xbb   : > { %1313 = vmatpush3.bf16.msra.mxu1 %v1446_v5  ;;  %1301 = vmatpush3.bf16.msra.mxu0 %v1447_v6  ;;  %s1742_s11 = smov [#allocation14]  }
  0xbc   : > { %1314 = vmatprep.subr.bf16.mxu1 %v1738_v0  ;;  %1302 = vmatprep.subr.bf16.mxu0 %v1738_v0  ;;  %p1624_p3 = pnand %p1623_p7, %p2228_p0 }
  0xbe   : > { %s1039_s27 = scalar_lea.hbm %s2227_s16, %s1276_s17  ;;  %p1625_p4 = pneg %p1624_p3 }
  0xbf   : > { %1315 = vmatpush3.bf16.msra.mxu1 %v1448_v7  ;;  %1303 = vmatpush3.bf16.msra.mxu0 %v1449_v8 }
  0xc0   : > { %1326 = vmatprep.subr.bf16.mxu1 %v1738_v0  ;;  %1320 = vmatprep.subr.bf16.mxu0 %v1738_v0 }
  0xc2   : > { %1317 = vmatmul.mubr.msk.bf16.vlgmr.msra.gmra.mxu1 %vm611_vm1, %v571_v9  ;;  %1305 = vmatmul.mubr.msk.bf16.vlgmr.msra.gmra.mxu0 %vm611_vm1, %v570_v10 }
  0xc3   : > { %1328 = vmatprep.mubr.msk.bf16.mxu1 %vm1739_vm0, %v1738_v0  ;;  %1322 = vmatprep.mubr.msk.bf16.mxu0 %vm1739_vm0, %v1738_v0 }
 0x182   : > { %v731_v12 = vpop.f32.mrf.mxu1  ;;  %v649_v14 = vpop.f32.mrf.mxu0 }
 0x183   : > { %v732_v13 = vadd.f32 %v1250_v11, %v731_v12  ;;  %v650_v21 = vadd.f32 %v1244_v16, %v649_v14 }
 0x184   : > { %v1318_v15 = vpop.f32.mrf.mxu1  ;;  %v1306_v18 = vpop.f32.mrf.mxu0 }
 0x185   : > { %v738_v17 = vpack.c.bf16 %v732_v13, %v732_v13  ;;  %v737_v25 = vpack.c.bf16 %v650_v21, %v650_v21 }
 0x186   : > { %v734_v19 = vpop.f32.mrf.mxu1  ;;  %v652_v22 = vpop.f32.mrf.mxu0 }
 0x187   : > { %v750_v20 = vsel %vm611_vm1, %v738_v17, 0  ;;  %806 = vrot.lane.b32.xlu1 %v738_v17, %s1740_s21  ;;  %s1626_s21 = sshll.u32 %s1742_s11, 4  ;;  %s1627_s21 = int_to_ptr.vmem [resolvable:$false] %s1626_s21 }
 0x188   : > { %v1319_v23 = vpop.f32.mrf.mxu1  ;;  %1321 = vmatpush3.bf16.xpose.msra.mxu0 %v750_v20  ;;  %v1307_v24 = vpop.f32.mrf.mxu0  ;;  %s1628_s1 = scalar_lea.vmem %s1627_s21, 512  ;;  %p1629_p8 = scmp.lt.s32.totalorder %s1042_s4, %s1627_s21 }
 0x189   : > { %1332 = vmatprep.subr.bf16.mxu0 %v1738_v0  ;;  %p1630_p6 = scmp.lt.s32.totalorder %s1628_s1, %s1622_s12 }
 0x18b   : > { %p1631_p11 = por %p1630_p6, %p1629_p8 }
 0x18d   : > { %p1632_p5 = pnand %p1631_p11, %p1625_p4 }
 0x18f   : > { %1323 = vmatmul.mubr.msk.bf16.vlgmr.msra.gmra.mxu0 %vm611_vm1, %v737_v25 }
 0x190   : > { %1340 = vmatprep.mubr.msk.bf16.mxu0 %vm1739_vm0, %v1738_v0  ;;  %1333 = vmatpush3.bf16.msra.mxu0 %v1452_v42 }
 0x191   : > { %1334 = vmatprep.subr.bf16.mxu0 %v1738_v0 }
 0x194   : > { %1335 = vmatpush3.bf16.msra.mxu0 %v1453_v43 }
 0x195   : > { %1336 = vmatprep.subr.bf16.mxu0 %v1738_v0 }
 0x198   : > { %1337 = vmatpush3.bf16.msra.mxu0 %v1454_v44 }
 0x199   : > { %1338 = vmatprep.subr.bf16.mxu0 %v1738_v0  ;;  %v1001_v0 = vrot.slane %v992_v59, %v1000_v60 }
 0x19c   : > { %1339 = vmatpush3.bf16.msra.mxu0 %v1455_v52 }
 0x1f9   : > { %v807_v26 = vpop.permute.xlu1 %806 }
 0x1fa   : > { %v813_v27 = vsel %vm811_vm2, %v807_v26, 0 }
 0x1fb   : > { %1327 = vmatpush3.bf16.msra.mxu1 %v813_v27 }
 0x1fc   : > { %1267 = vmatprep.subr.msk.bf16.mxu1 %vm811_vm2, %v1266_v41 }
 0x24f   : > { %v786_v29 = vpop.f32.mrf.mxu0 }
 0x250   : > { %v787_v30 = vadd.f32 %v1256_v28, %v786_v29 }
 0x251   : > { %v1324_v31 = vpop.f32.mrf.mxu0 }
 0x252   : > { %v793_v32 = vsel %vm792_vm3, %v787_v30, -inf }
 0x253   : > { %794 = vmax.xlane.f32.xlu0 %v793_v32  ;;  %v789_v33 = vpop.f32.mrf.mxu0 }
 0x255   : > { %v1325_v34 = vpop.f32.mrf.mxu0 }
 0x2dc   : > { %v795_v35 = vpop.xlane.xlu0 %794 }
 0x2dd   : > { %v796_v36 = vsub.f32 %v787_v30, %v795_v35 }
 0x2df   : > { %v797_v37 = vmul.f32 1.442695, %v796_v36 }
 0x2e1   : > { %1456 = vpow2.f32 %v797_v37 }
 0x2ee   : > { %v1457_v38 = vpop.eup %1456 }
 0x2ef   : > { %v799_v39 = vsel %vm792_vm3, %v1457_v38, 0.0 }
 0x2f0   : > { %800 = vadd.xlane.f32.xlu0 %v799_v39 }
 0x379   : > { %v801_v45 = vpop.xlane.xlu0 %800 }
 0x37a   : > { %1458 = vrcp.f32 %v801_v45 }
 0x387   : > { %v1459_v47 = vpop.eup %1458 }
 0x388   : > { %v803_v48 = vmul.f32 %v1459_v47, %v1457_v38 }
 0x38a   : > { %v804_v49 = vpack.c.bf16 %v803_v48, %v803_v48 }
 0x38c   : > { %1329 = vmatmul.mubr.msk.bf16.vlgmr.msra.gmra.mxu1 %vm792_vm3, %v804_v49 }
 0x38d   : > { %966 = vmatpush1.bf16.msra.mxu1 %v946_v50  ;;  %983 = vmatprep.mubr.bf16.mxu1 %v1741_v51 }
 0x394   : > { %1268 = vmatmul.mubr.msk.bf16.vlgmr.msra.gmra.mxu1 %vm792_vm3, %v804_v49 }
 0x44c   : > { %v849_v55 = vpop.f32.mrf.mxu1 }
 0x44d   : > { %v855_v56 = vpack.c.bf16 %v849_v55, %v849_v55 }
 0x44e   : > { %v1330_v58 = vpop.f32.mrf.mxu1 }
 0x44f   : > { %1341 = vmatmul.mubr.msk.bf16.vlgmr.msra.gmra.mxu0 %vm611_vm1, %v855_v56 }
 0x450   : > { %v852_v61 = vpop.f32.mrf.mxu1 }
 0x452   : > { %v1331_v63 = vpop.f32.mrf.mxu1 }
 0x454   : > { %v985_v1 = vpop.f32.mrf.mxu1 }
 0x455   : > { %v1004_v2 = vmul.f32 %v997_v62, %v985_v1 }
 0x456   : > { %v987_v3 = vpop.f32.mrf.mxu1 }
 0x457   : > { %1006 = vst [vmem:[%s564_s19] sm:$0xff] %v1004_v2  ;;  %v1005_v4 = vmul.f32 %v1001_v0, %v987_v3 }
 0x458   : > { %v989_v5 = vpop.f32.mrf.mxu1 }
 0x459   : > { %1007 = vst [vmem:[%s564_s19 + $0x8] sm:$0xff] %v1005_v4 }
 0x45a   : > { %v990_v6 = vpop.f32.mrf.mxu1 }
 0x45b   : > { %1635 = shalt.err (!%p1632_p5)
}
 0x45c   : > { %s1636_s18 = scalar_lea.hbm %s1039_s27, 256  ;;  %s1640_s28 = scalar_lea.hbm %s2227_s16, 512 }
 0x45d   : > { %p1637_p10 = scmp.ne.s32.totalorder %s1039_s27, %s1636_s18  ;;  %p1641_p13 = scmp.lt.s32.totalorder %s1039_s27, %s2227_s16 }
 0x45e   : > { %p1642_p1 = scmp.lt.s32.totalorder %s1640_s28, %s1636_s18 }
 0x45f   : > { %p1638_p9 = pnand %p1637_p10, %p2228_p0 }
 0x460   : > { %p1643_p12 = por %p1642_p1, %p1641_p13 }
 0x461   : > { %p1639_p2 = pneg %p1638_p9 }
 0x463   : > { %p1644_p7 = pnand %p1643_p12, %p1639_p2 }
 0x465   : > { %1647 = shalt.err (!%p1644_p7)
}
 0x466   : > { %1363 = dma.vmem_to_hbm [thread:$0]  (%p2228_p0), %s1042_s4, 256, %s1039_s27, %s1014_s9  }
 0x467   : > { %s1241_s30 = sshll.u32 %s2007_s0, 3  ;;  %s2229_s29 = sld [smem:[#allocation31_spill]] }
 0x468   : > { %s1271_s13 = sshll.u32 %s1830_s25, 7  ;;  %s557_s12 = scalar_lea.vmem [#allocation13], %s1241_s30 }
 0x469   : > { %s1027_s11 = sshll.u32 %s557_s12, 4  ;;  %s2230_s18 = sld [smem:[#allocation32_spill]]  ;;  %s2115_s11 = int_to_ptr.vmem [resolvable:$true] %s1027_s11 }
 0x46a   : > { %s1009_s4 = scalar_lea.sflag [#allocation4], %s2007_s0  ;;  %s1648_s27 = scalar_lea.vmem %s2115_s11, 128 }
 0x46b   : > { %p1649_p3 = scmp.ne.s32.totalorder %s2115_s11, %s1648_s27  ;;  %s1743_s25 = smov [#allocation13]  }
 0x46c   : > { %s1652_s9 = sshll.u32 %s1743_s25, 4  ;;  %s1653_s9 = int_to_ptr.vmem [resolvable:$false] %s1652_s9 }
 0x46d   : > { %v1259_v7 = vld [vmem:[%s2229_s29] ss:$0 sm:$0xff]  ;;  %p1650_p4 = pnand %p1649_p3, %p2228_p0  ;;  %s1654_s14 = scalar_lea.vmem %s1653_s9, 256 }
 0x46e   : > { %p1655_p6 = scmp.lt.s32.totalorder %s2115_s11, %s1653_s9  ;;  %p1656_p11 = scmp.lt.s32.totalorder %s1654_s14, %s1648_s27 }
 0x46f   : > { %s2113_s15 = scalar_lea.hbm %s2230_s18, %s1271_s13  ;;  %p1651_p8 = pneg %p1650_p4 }
 0x470   : > { %p1657_p5 = por %p1656_p11, %p1655_p6 }
 0x472   : > { %p1658_p10 = pnand %p1657_p5, %p1651_p8 }
 0x50f   : > { %v932_v8 = vpop.f32.mrf.mxu0 }
 0x510   : > { %v933_v9 = vadd.f32 %v1259_v7, %v932_v8 }
 0x511   : > { %v1342_v10 = vpop.f32.mrf.mxu0 }
 0x512   : > { %938 = vst [vmem:[%s557_s12] sm:$0xff] %v933_v9 }
 0x513   : > { %v935_v11 = vpop.f32.mrf.mxu0 }
 0x514   : > { %1661 = shalt.err (!%p1658_p10)
}
 0x515   : > { %s1662_s28 = scalar_lea.hbm %s2113_s15, 128  ;;  %s1666_s20 = scalar_lea.hbm %s2230_s18, 256 }
 0x516   : > { %p1663_p9 = scmp.ne.s32.totalorder %s2113_s15, %s1662_s28  ;;  %p1667_p1 = scmp.lt.s32.totalorder %s2113_s15, %s2230_s18 }
 0x517   : > { %p1668_p12 = scmp.lt.s32.totalorder %s1666_s20, %s1662_s28 }
 0x518   : > { %p1664_p2 = pnand %p1663_p9, %p2228_p0 }
 0x519   : > { %p1669_p7 = por %p1668_p12, %p1667_p1 }
 0x51a   : > { %p1665_p13 = pneg %p1664_p2 }
 0x51c   : > { %p1670_p3 = pnand %p1669_p7, %p1665_p13 }
 0x51e   : > { %1673 = shalt.err (!%p1670_p3)
}
 0x51f   : > { %1362 = dma.vmem_to_hbm [thread:$0]  (%p2228_p0), %s2115_s11, 128, %s2113_s15, %s1009_s4   ;;  %v1343_v12 = vpop.f32.mrf.mxu0 }
 0x520 PF: > { %s2231_s17 = sld [smem:[#allocation22_spill]]  ;;  %p2234_p8 = scmp.ge.s32.totalorder %s1728_s24, 2 }
 0x521   : > { %s2232_s29 = sld [smem:[#allocation24_spill]] }
 0x526   : > { %s1053_s13 = sand.u32 1, %s2231_s17  }
 0x527   : > { %p2233_p4 = scmp.ne.s32.totalorder %s2232_s29, 0  ;;  %s1054_s12 = scalar_lea.sflag [#allocation4], %s1053_s13 }
 0x529   : > { %p1387_p6 = pnand %p2234_p8, %p2233_p4 }
 0x52b   : > { %p1388_p11 = pneg %p1387_p6 }
 0x52d   : > { %1707 = dma.done.wait (%p1388_p11), %s1054_s12, 128  }
 0x52e   : > { %1709 = vsyncadd (%p1388_p11), %s1054_s12, 4294967168  ;;  %s1063_s21 = scalar_lea.sflag [#allocation15], %s1053_s13 }
 0x52f   : > { %1711 = dma.done.wait (%p1388_p11), %s1063_s21, 256  }
 0x530   : > { %1713 = vsyncadd (%p1388_p11), %s1063_s21, 4294967040  ;;  %s2235_s24 = sld [smem:[#allocation25_spill]]  ;;  %s2238_s21 = smov %s1720_s22 }
 0x531   : > { %s2236_s23 = sld [smem:[#allocation23_spill]] }
 0x532   : > { %s2237_s11 = sld [smem:[#allocation26_spill]] }
 0x536   : > { %p34_p0 = scmp.ge.s32.totalorder %s2235_s24, 4  }
 0x537   : > { %s2239_s22 = smov %s2236_s23 }
 0x538   : > { %s2240_s23 = smov %s2237_s11  ;;  %36 = sbr.rel (!%p34_p0) target bundleno = 18 (0x12), region = 165 }
 0x53d   :  { %1068 = vsyncpa [#allocation3], 1 }
 0x53e   :  { %1070 = vsyncpa [#allocation3 + $0x1], 1 }
 0x53f   :  { %1071 = vsyncpa [#allocation6], 1 }
 0x540   :  { %1073 = vsyncpa [#allocation6 + $0x1], 1 }
 0x541   :  { %1074 = vsyncpa [#allocation9], 1 }
 0x542   :  { %1075 = vsyncpa [#allocation12], 1 }
 0x543   :  { %1076 = vsyncpa [#allocation4], 1 }
 0x544   :  { %1078 = vsyncpa [#allocation4 + $0x1], 1 }
 0x545   :  { %1079 = vsyncpa [#allocation15], 1 }
 0x546   :  { %1081 = vsyncpa [#allocation15 + $0x1], 1 }

</bundles_post_ra>
